<compile_context>
chip_gen: v7x
topology: tpu7x:2x2x1
jax: 0.10.0
libtpu: 0.0.40
codegen_flags: <defaults>
</compile_context>

<pallas_src>
import functools
import math

import jax
import jax.numpy as jnp
from jax import lax
from jax.experimental import pallas as pl
from jax.experimental.pallas import tpu as pltpu

EPS = 1e-7           # module-level EPS
IOU_EPS = 1e-6       # mmdet BboxOverlaps2D eps
INF = 1e8            # module-level INF
COST_CAP = 1e30      # cap for match-loop keys (keeps inf-cost entries orderable)
KEY_LO = 1e-30       # lower clamp for keys (keeps key floats normal)
MASK_KEY = 3e38      # > any key; marks already-picked lanes
LN10 = math.log(10.0)


def _dsl_assign_kernel(pb_ref, ps_ref, pr_ref, gl_ref, gb_ref, gbt_ref,
                       glt_ref, pf_ref, out_ref, cost_scr, ious_scr,
                       *, num_classes, soft_center_radius, candidate_topk,
                       iou_weight, n_real, tile_n):
    f32 = jnp.float32
    N = pb_ref.shape[1]          # padded prior count (lane axis)
    C = ps_ref.shape[0]
    G = gb_ref.shape[0]
    num_tiles = N // tile_n

    # ---- per-gt quantities (loop invariant) ---------------------------------
    gb = gb_ref[...]                       # (G, 4)
    lab = gl_ref[...]                      # (G, 1) int32
    pad_col = pf_ref[...]                  # (G, 1) f32
    gt_valid = pad_col > 0.0               # (G, 1)

    gx1 = gb[:, 0:1]
    gy1 = gb[:, 1:2]
    gx2 = gb[:, 2:3]
    gy2 = gb[:, 3:4]
    gcx = (gx1 + gx2) * 0.5
    gcy = (gy1 + gy2) * 0.5
    area_g = (gx2 - gx1) * (gy2 - gy1)

    # one-hot class gather runs on the MXU in bf16 (exact for a 0/1 matrix)
    class_iota = lax.broadcasted_iota(jnp.int32, (G, C), 1)
    onehot_bf = (class_iota == lab).astype(jnp.bfloat16)           # (G, C)

    # ---- phase 1: cost / IoU construction, tiled over the lane axis ---------
    def build_tile(t, carry):
        s = pl.multiple_of(t * tile_n, tile_n)
        pbt = pb_ref[:, pl.ds(s, tile_n)]      # (4, TN) pred xyxy (lane-dense)
        pri = pr_ref[:, pl.ds(s, tile_n)]      # (4, TN) priors (cx,cy,sw,sh)
        px1 = pbt[0:1]
        py1 = pbt[1:2]
        px2 = pbt[2:3]
        py2 = pbt[3:4]
        cx = pri[0:1]
        cy = pri[1:2]
        stride = pri[2:3]

        # find_inside_points (box_dim == 4) + pad-gt masking
        d1 = cx - gx1
        d2 = cy - gy1
        d3 = gx2 - cx
        d4 = gy2 - cy
        min_delta = jnp.minimum(jnp.minimum(d1, d2), jnp.minimum(d3, d4))
        is_in = (min_delta > 0.0).astype(f32) * pad_col            # (G, TN)
        valid = jnp.sum(is_in, axis=0, keepdims=True) > 0.0        # (1, TN)
        if n_real < N:  # padded lanes are never valid
            lane = lax.broadcasted_iota(jnp.int32, (1, tile_n), 1) + s
            valid = valid & (lane < n_real)

        # soft center prior: 10 ** (dist - radius)   (no dead valid multiply)
        dx = cx - gcx
        dy = cy - gcy
        dist = jnp.sqrt(dx * dx + dy * dy) / stride
        soft_center = jnp.exp((dist - soft_center_radius) * LN10)

        # pairwise IoU (mmdet BboxOverlaps2D, mode='iou')
        area_p = (px2 - px1) * (py2 - py1)
        lt_x = jnp.maximum(px1, gx1)
        lt_y = jnp.maximum(py1, gy1)
        rb_x = jnp.minimum(px2, gx2)
        rb_y = jnp.minimum(py2, gy2)
        w = jnp.maximum(rb_x - lt_x, 0.0)
        h = jnp.maximum(rb_y - lt_y, 0.0)
        overlap = w * h
        union = jnp.maximum(area_p + area_g - overlap, IOU_EPS)
        ious = overlap / union                                     # (G, TN)

        iou_cost = -jnp.log(ious + EPS) * iou_weight

        # per-gt class logits via MXU one-hot gather (bf16 operands, f32 acc)
        sc = ps_ref[:, pl.ds(s, tile_n)].astype(jnp.bfloat16)      # (C, TN)
        pps = jnp.dot(onehot_bf, sc, preferred_element_type=f32)   # (G, TN)

        # sigmoid and BCE-with-logits share one exponential (exact divide)
        e = jnp.exp(-jnp.abs(pps))
        denom = 1.0 + e
        sig = jnp.where(pps >= 0.0, 1.0, e) / denom
        softplus = jnp.log(denom)
        bce = jnp.maximum(pps, 0.0) - pps * ious + softplus
        scale = ious - sig
        cost = bce * (scale * scale) + iou_cost + soft_center
        cost = jnp.where(valid, cost, INF)

        ious_scr[:, pl.ds(s, tile_n)] = ious
        cost_scr[:, pl.ds(s, tile_n)] = cost
        return carry

    lax.fori_loop(0, num_tiles, build_tile, 0, unroll=False)

    # ---- phase 2: dynamic_k_matching over the full (G, N) scratch -----------
    ious = ious_scr[...]                                           # (G, N)
    cost = cost_scr[...]                                           # (G, N)
    lane_iota = lax.broadcasted_iota(jnp.int32, (1, N), 1)

    # dynamic_ks = floor(sum of top-k IoUs): kept exact (feeds an int floor)
    def topk_body(_, carry):
        work, ssum = carry
        m = jnp.max(work, axis=1, keepdims=True)                   # (G, 1)
        first = jnp.min(jnp.where(work == m, lane_iota, N),
                        axis=1, keepdims=True)
        picked = lane_iota == first
        ssum = ssum + m
        work = jnp.where(picked, -1.0, work)
        return work, ssum

    _, topk_sum = lax.fori_loop(0, candidate_topk, topk_body,
                                (ious, jnp.zeros((G, 1), f32)), unroll=False)
    dynamic_ks = jnp.maximum(topk_sum.astype(jnp.int32), 1)        # (G, 1)

    # conflict-resolution argmin (first gt attaining the per-prior min cost)
    g_iota = lax.broadcasted_iota(jnp.int32, (G, 1), 0)
    rmin = jnp.min(cost, axis=0, keepdims=True)
    first_g = jnp.min(jnp.where(cost == rmin, g_iota, G),
                      axis=0, keepdims=True)
    row_onehot = (g_iota == first_g).astype(f32)                   # (G, N)

    # Packed (cost, lane) keys: one lane-min per iteration yields both the row
    # minimum and its first lane index (halves the reductions of the hottest
    # loop).  The low idx_bits mantissa bits of the cost carry the lane index,
    # so costs closer than ~2^-(23-idx_bits) relative collapse to index order
    # (ranking-only deviation vs. the reference).
    idx_bits = max(1, (N - 1).bit_length())
    idx_mask = (1 << idx_bits) - 1
    cbits = pltpu.bitcast(jnp.clip(cost, KEY_LO, COST_CAP), jnp.int32)
    keybits = (cbits & jnp.int32(~idx_mask)) | lane_iota
    key0 = pltpu.bitcast(keybits, f32)    # finite, positive, order-preserving

    def match_body(k, carry):
        key, matching = carry
        kmin = jnp.min(key, axis=1, keepdims=True)                 # (G, 1)
        picked = key == kmin                                       # unique/row
        take = (k < dynamic_ks) & gt_valid                         # (G, 1)
        matching = jnp.where(picked & take, 1.0, matching)
        key = jnp.where(picked, MASK_KEY, key)
        return key, matching

    _, matching = lax.fori_loop(0, candidate_topk, match_body,
                                (key0, jnp.zeros((G, N), f32)), unroll=False)

    # priors matched to more than one gt keep only their min-cost gt
    match_count = jnp.sum(matching, axis=0, keepdims=True)
    matching = jnp.where(match_count > 1.0, row_onehot, matching)

    # ---- outputs: one small MXU matmul + one sublane reduction --------------
    metrics = jnp.sum(matching * ious, axis=0, keepdims=True)      # (1, N)

    gbT = gbt_ref[...]                                             # (4, G)
    labT = glt_ref[...]                                            # (1, G)
    wt = jnp.concatenate([gbT, labT, jnp.ones((1, G), f32),
                          jnp.zeros((2, G), f32)], axis=0)         # (8, G)
    gathered = jnp.dot(wt, matching, preferred_element_type=f32)   # (8, N)

    fg_mask = gathered[5:6, :] > 0.0                               # (1, N)
    labels_f = jnp.where(fg_mask, gathered[4:5, :], float(num_classes))

    # single 8-sublane, lane-dense store (rows: 0-3 bbox, 4 metrics, 5 labels)
    out_ref[...] = jnp.concatenate(
        [gathered[0:4, :], metrics, labels_f, gathered[6:8, :]], axis=0)


def _round_up(x, m):
    return ((x + m - 1) // m) * m


def batch_dynamic_soft_label_assign(pred_bboxes, pred_scores, priors,
                                    gt_labels, gt_bboxes, pad_bbox_flag,
                                    *, num_classes, soft_center_radius=3.0,
                                    topk=13, iou_weight=3.0, lane_tile=512):
    """Pure-function equivalent of BatchDynamicSoftLabelAssigner.forward."""
    B, N, _ = pred_bboxes.shape
    C = pred_scores.shape[-1]
    G = gt_bboxes.shape[1]
    # TODO(synk): the num_gt == 0 / num_bboxes == 0 early-return branch of the
    # PyTorch module is not reproduced here (it requires G > 0, N > 0).

    # Pad the prior axis to a clean lane tiling; padded lanes are forced
    # invalid in-kernel and sliced off afterwards.
    if N <= lane_tile:
        n_pad = _round_up(N, 128)
        tile_n = n_pad
    else:
        tile_n = lane_tile
        n_pad = _round_up(N, tile_n)
    pad = n_pad - N

    f32 = jnp.float32
    pred_bboxes_t = jnp.transpose(pred_bboxes.astype(f32), (0, 2, 1))  # (B,4,N)
    pred_scores_t = jnp.transpose(pred_scores.astype(f32), (0, 2, 1))  # (B,C,N)
    priors_t = jnp.transpose(priors.astype(f32), (1, 0))               # (4,N)
    if pad:
        pred_bboxes_t = jnp.pad(pred_bboxes_t, ((0, 0), (0, 0), (0, pad)))
        pred_scores_t = jnp.pad(pred_scores_t, ((0, 0), (0, 0), (0, pad)))
        # padded priors: centre 0, stride 1 (avoids 0-division); masked invalid
        priors_t = jnp.concatenate(
            [priors_t,
             jnp.concatenate([jnp.zeros((2, pad), f32),
                              jnp.ones((2, pad), f32)], axis=0)], axis=1)

    gt_bboxes_f = gt_bboxes.astype(f32)
    gt_labels_i = gt_labels.astype(jnp.int32)
    pad_flag_f = pad_bbox_flag.astype(f32)
    gt_bboxes_tt = jnp.transpose(gt_bboxes_f, (0, 2, 1))               # (B,4,G)
    gt_labels_tt = jnp.transpose(gt_labels.astype(f32), (0, 2, 1))     # (B,1,G)

    kernel = functools.partial(
        _dsl_assign_kernel,
        num_classes=num_classes,
        soft_center_radius=soft_center_radius,
        candidate_topk=min(topk, N),
        iou_weight=iou_weight,
        n_real=N,
        tile_n=tile_n,
    )

    # Explicit VMEM budget: double-buffered in/out blocks + persistent scratch
    # + selection-phase working set + per-tile temporaries (fits v7x 64 MiB at
    # realistic detection sizes thanks to the tiled construction).
    def _bytes(*shape):
        n = 4
        for s in shape:
            n *= s
        return n

    est = 2 * (_bytes(4, n_pad) + _bytes(C, n_pad) + _bytes(4, n_pad)
               + 2 * _bytes(G, 1) + _bytes(G, 4) + _bytes(4, G) + _bytes(1, G)
               + _bytes(8, n_pad))
    est += 2 * _bytes(G, n_pad)        # cost / iou persistent scratch
    est += 8 * _bytes(G, n_pad)        # selection-loop live values
    est += 16 * _bytes(G, tile_n)      # construction tile working set
    vmem_limit = max(32 * 1024 * 1024,
                     min(int(est * 1.3) + (2 << 20), 100 * 1024 * 1024))

    grid_spec = pltpu.PrefetchScalarGridSpec(
        num_scalar_prefetch=0,
        grid=(B,),
        in_specs=[
            pl.BlockSpec((None, 4, n_pad), lambda b: (b, 0, 0)),   # pred_bboxes
            pl.BlockSpec((None, C, n_pad), lambda b: (b, 0, 0)),   # pred_scores
            pl.BlockSpec((4, n_pad), lambda b: (0, 0)),            # priors
            pl.BlockSpec((None, G, 1), lambda b: (b, 0, 0)),       # gt_labels
            pl.BlockSpec((None, G, 4), lambda b: (b, 0, 0)),       # gt_bboxes
            pl.BlockSpec((None, 4, G), lambda b: (b, 0, 0)),       # gt_bboxes^T
            pl.BlockSpec((None, 1, G), lambda b: (b, 0, 0)),       # gt_labels^T
            pl.BlockSpec((None, G, 1), lambda b: (b, 0, 0)),       # pad_bbox_flag
        ],
        out_specs=pl.BlockSpec((None, 8, n_pad), lambda b: (b, 0, 0)),
        scratch_shapes=[pltpu.VMEM((G, n_pad), jnp.float32),       # cost
                        pltpu.VMEM((G, n_pad), jnp.float32)],      # pairwise iou
    )

    slab = pl.pallas_call(
        kernel,
        out_shape=jax.ShapeDtypeStruct((B, 8, n_pad), jnp.float32),
        grid_spec=grid_spec,
        compiler_params=pltpu.CompilerParams(
            dimension_semantics=("parallel",),      # batch items independent
            vmem_limit_bytes=vmem_limit),
    )(pred_bboxes_t, pred_scores_t, priors_t, gt_labels_i, gt_bboxes_f,
      gt_bboxes_tt, gt_labels_tt, pad_flag_f)

    slab = slab[:, :, :N]
    return dict(
        assigned_labels=slab[:, 5, :].astype(jnp.int32),
        assigned_labels_weights=jnp.ones((B, N), jnp.float32),  # constant output
        assigned_bboxes=jnp.transpose(slab[:, 0:4, :], (0, 2, 1)),
        assign_metrics=slab[:, 4, :],
    )


if __name__ == "__main__":
    key = jax.random.PRNGKey(0)
    B, G, C = 2, 8, 4
    num_classes = C
    feat = 8
    stride = 8.0
    N = feat * feat  # 64 priors

    # priors: 8x8 grid of (cx, cy, stride, stride)
    ys, xs = jnp.meshgrid(jnp.arange(feat, dtype=jnp.float32),
                          jnp.arange(feat, dtype=jnp.float32), indexing="ij")
    pcx = (xs.reshape(-1) + 0.5) * stride
    pcy = (ys.reshape(-1) + 0.5) * stride
    priors = jnp.stack(
        [pcx, pcy, jnp.full((N,), stride), jnp.full((N,), stride)], axis=1)

    k1, k2, k3, k4, k5 = jax.random.split(key, 5)
    ctr_noise = jax.random.uniform(k1, (B, N, 2), minval=-4.0, maxval=4.0)
    wh = jax.random.uniform(k2, (B, N, 2), minval=4.0, maxval=24.0)
    centers = priors[None, :, :2] + ctr_noise
    pred_bboxes = jnp.concatenate([centers - wh / 2, centers + wh / 2], axis=-1)

    pred_scores = jax.random.normal(k3, (B, N, C), dtype=jnp.float32)

    gt_ctr = jax.random.uniform(k4, (B, G, 2), minval=8.0, maxval=56.0)
    gt_wh = jax.random.uniform(k5, (B, G, 2), minval=8.0, maxval=32.0)
    gt_bboxes = jnp.concatenate([gt_ctr - gt_wh / 2, gt_ctr + gt_wh / 2], axis=-1)

    gt_labels = jax.random.randint(jax.random.PRNGKey(1), (B, G, 1), 0,
                                   num_classes).astype(jnp.int32)
    num_valid = jnp.array([5, 3], dtype=jnp.int32)
    pad_bbox_flag = (jnp.arange(G)[None, :] < num_valid[:, None]
                     ).astype(jnp.float32)[..., None]

    out = batch_dynamic_soft_label_assign(
        pred_bboxes, pred_scores, priors, gt_labels, gt_bboxes, pad_bbox_flag,
        num_classes=num_classes, soft_center_radius=3.0, topk=13,
        iou_weight=3.0)
    out = jax.block_until_ready(out)

    assert out["assigned_labels"].shape == (B, N)
    assert out["assigned_labels"].dtype == jnp.int32
    assert out["assigned_labels_weights"].shape == (B, N)
    assert out["assigned_bboxes"].shape == (B, N, 4)
    assert out["assign_metrics"].shape == (B, N)
    assert bool(jnp.all(out["assigned_labels"] >= 0))
    assert bool(jnp.all(out["assigned_labels"] <= num_classes))
    assert bool(jnp.all(jnp.isfinite(out["assign_metrics"])))
    assert bool(jnp.all(out["assign_metrics"] >= 0.0))
    assert bool(jnp.all(out["assign_metrics"] <= 1.0))

    print("KERNEL_OK")
</pallas_src>

<mosaic_0001>
module attributes {stable_mosaic.version = 11 : i64} {
  func.func @_dsl_assign_kernel(%arg0: i32, %arg1: memref<1x4x128xf32, #tpu.memory_space<vmem>>, %arg2: memref<1x4x128xf32, #tpu.memory_space<vmem>>, %arg3: memref<4x128xf32, #tpu.memory_space<vmem>>, %arg4: memref<1x8x1xi32, #tpu.memory_space<vmem>>, %arg5: memref<1x8x4xf32, #tpu.memory_space<vmem>>, %arg6: memref<1x4x8xf32, #tpu.memory_space<vmem>>, %arg7: memref<1x1x8xf32, #tpu.memory_space<vmem>>, %arg8: memref<1x8x1xf32, #tpu.memory_space<vmem>>, %arg9: memref<1x8x128xf32, #tpu.memory_space<vmem>>, %arg10: memref<8x128xf32, #tpu.memory_space<vmem>>, %arg11: memref<8x128xf32, #tpu.memory_space<vmem>>) attributes {dimension_semantics = [#tpu.dimension_semantics<parallel>], iteration_bounds = array<i64: 2>, scalar_prefetch = 0 : i64, scratch_operands = 2 : i64, tpu.core_type = #tpu.core_type<tc>, window_params = [{transform_indices = @transform_0, window_bounds = array<i64: 1, 4, 128>}, {transform_indices = @transform_1, window_bounds = array<i64: 1, 4, 128>}, {pipeline_mode = #tpu.pipeline_mode<synchronous>, transform_indices = @transform_2, window_bounds = array<i64: 4, 128>}, {transform_indices = @transform_3, window_bounds = array<i64: 1, 8, 1>}, {transform_indices = @transform_4, window_bounds = array<i64: 1, 8, 4>}, {transform_indices = @transform_5, window_bounds = array<i64: 1, 4, 8>}, {transform_indices = @transform_6, window_bounds = array<i64: 1, 1, 8>}, {transform_indices = @transform_7, window_bounds = array<i64: 1, 8, 1>}, {transform_indices = @transform_8, window_bounds = array<i64: 1, 8, 128>}]} {
    %c0 = arith.constant 0 : index
    %c0_0 = arith.constant 0 : index
    %c0_1 = arith.constant 0 : index
    %0 = vector.load %arg5[%c0, %c0_0, %c0_1] : memref<1x8x4xf32, #tpu.memory_space<vmem>>, vector<1x8x4xf32>
    %1 = vector.shape_cast %0 : vector<1x8x4xf32> to vector<8x4xf32>
    %c0_2 = arith.constant 0 : index
    %c0_3 = arith.constant 0 : index
    %c0_4 = arith.constant 0 : index
    %2 = vector.load %arg4[%c0_2, %c0_3, %c0_4] : memref<1x8x1xi32, #tpu.memory_space<vmem>>, vector<1x8x1xi32>
    %3 = vector.shape_cast %2 : vector<1x8x1xi32> to vector<8x1xi32>
    %c0_5 = arith.constant 0 : index
    %c0_6 = arith.constant 0 : index
    %c0_7 = arith.constant 0 : index
    %4 = vector.load %arg8[%c0_5, %c0_6, %c0_7] : memref<1x8x1xf32, #tpu.memory_space<vmem>>, vector<1x8x1xf32>
    %5 = vector.shape_cast %4 : vector<1x8x1xf32> to vector<8x1xf32>
    %cst = arith.constant 0.000000e+00 : f32
    %6 = vector.broadcast %cst : f32 to vector<8x1xf32>
    %7 = arith.cmpf ogt, %5, %6 : vector<8x1xf32>
    %8 = vector.extract_strided_slice %1 {offsets = [0, 0], sizes = [8, 1], strides = [1, 1]} : vector<8x4xf32> to vector<8x1xf32>
    %9 = vector.extract_strided_slice %1 {offsets = [0, 1], sizes = [8, 1], strides = [1, 1]} : vector<8x4xf32> to vector<8x1xf32>
    %10 = vector.extract_strided_slice %1 {offsets = [0, 2], sizes = [8, 1], strides = [1, 1]} : vector<8x4xf32> to vector<8x1xf32>
    %11 = vector.extract_strided_slice %1 {offsets = [0, 3], sizes = [8, 1], strides = [1, 1]} : vector<8x4xf32> to vector<8x1xf32>
    %12 = arith.addf %8, %10 : vector<8x1xf32>
    %cst_8 = arith.constant 5.000000e-01 : f32
    %13 = vector.broadcast %cst_8 : f32 to vector<8x1xf32>
    %14 = arith.mulf %12, %13 : vector<8x1xf32>
    %15 = arith.addf %9, %11 : vector<8x1xf32>
    %cst_9 = arith.constant 5.000000e-01 : f32
    %16 = vector.broadcast %cst_9 : f32 to vector<8x1xf32>
    %17 = arith.mulf %15, %16 : vector<8x1xf32>
    %18 = arith.subf %10, %8 : vector<8x1xf32>
    %19 = arith.subf %11, %9 : vector<8x1xf32>
    %20 = arith.mulf %18, %19 : vector<8x1xf32>
    %21 = tpu.iota {dimensions = array<i32: 1>} : vector<8x4xi32>
    %22 = vector.broadcast %3 : vector<8x1xi32> to vector<8x4xi32>
    %23 = arith.cmpi eq, %21, %22 : vector<8x4xi32>
    %24 = arith.extui %23 : vector<8x4xi1> to vector<8x4xi32>
    %25 = arith.sitofp %24 : vector<8x4xi32> to vector<8x4xf32>
    %26 = arith.truncf %25 : vector<8x4xf32> to vector<8x4xbf16>
    %c0_i32 = arith.constant 0 : i32
    %c128_i32 = arith.constant 128 : i32
    %27 = arith.muli %c0_i32, %c128_i32 : i32
    %28 = tpu.assume_multiple %27, 128 : i32
    %c0_10 = arith.constant 0 : index
    %c0_11 = arith.constant 0 : index
    %29 = arith.index_cast %28 : i32 to index
    %30 = vector.load %arg1[%c0_10, %c0_11, %29] : memref<1x4x128xf32, #tpu.memory_space<vmem>>, vector<1x4x128xf32>
    %31 = vector.shape_cast %30 : vector<1x4x128xf32> to vector<4x128xf32>
    %c0_12 = arith.constant 0 : index
    %32 = arith.index_cast %28 : i32 to index
    %33 = vector.load %arg3[%c0_12, %32] : memref<4x128xf32, #tpu.memory_space<vmem>>, vector<4x128xf32>
    %34 = vector.extract_strided_slice %31 {offsets = [0, 0], sizes = [1, 128], strides = [1, 1]} : vector<4x128xf32> to vector<1x128xf32>
    %35 = vector.extract_strided_slice %31 {offsets = [1, 0], sizes = [1, 128], strides = [1, 1]} : vector<4x128xf32> to vector<1x128xf32>
    %36 = vector.extract_strided_slice %31 {offsets = [2, 0], sizes = [1, 128], strides = [1, 1]} : vector<4x128xf32> to vector<1x128xf32>
    %37 = vector.extract_strided_slice %31 {offsets = [3, 0], sizes = [1, 128], strides = [1, 1]} : vector<4x128xf32> to vector<1x128xf32>
    %38 = vector.extract_strided_slice %33 {offsets = [0, 0], sizes = [1, 128], strides = [1, 1]} : vector<4x128xf32> to vector<1x128xf32>
    %39 = vector.extract_strided_slice %33 {offsets = [1, 0], sizes = [1, 128], strides = [1, 1]} : vector<4x128xf32> to vector<1x128xf32>
    %40 = vector.extract_strided_slice %33 {offsets = [2, 0], sizes = [1, 128], strides = [1, 1]} : vector<4x128xf32> to vector<1x128xf32>
    %41 = vector.broadcast %38 : vector<1x128xf32> to vector<8x128xf32>
    %42 = vector.broadcast %8 : vector<8x1xf32> to vector<8x128xf32>
    %43 = arith.subf %41, %42 : vector<8x128xf32>
    %44 = vector.broadcast %39 : vector<1x128xf32> to vector<8x128xf32>
    %45 = vector.broadcast %9 : vector<8x1xf32> to vector<8x128xf32>
    %46 = arith.subf %44, %45 : vector<8x128xf32>
    %47 = vector.broadcast %10 : vector<8x1xf32> to vector<8x128xf32>
    %48 = vector.broadcast %38 : vector<1x128xf32> to vector<8x128xf32>
    %49 = arith.subf %47, %48 : vector<8x128xf32>
    %50 = vector.broadcast %11 : vector<8x1xf32> to vector<8x128xf32>
    %51 = vector.broadcast %39 : vector<1x128xf32> to vector<8x128xf32>
    %52 = arith.subf %50, %51 : vector<8x128xf32>
    %53 = arith.minimumf %43, %46 : vector<8x128xf32>
    %54 = arith.minimumf %49, %52 : vector<8x128xf32>
    %55 = arith.minimumf %53, %54 : vector<8x128xf32>
    %cst_13 = arith.constant 0.000000e+00 : f32
    %56 = vector.broadcast %cst_13 : f32 to vector<8x128xf32>
    %57 = arith.cmpf ogt, %55, %56 : vector<8x128xf32>
    %58 = arith.extui %57 : vector<8x128xi1> to vector<8x128xi32>
    %59 = arith.sitofp %58 : vector<8x128xi32> to vector<8x128xf32>
    %60 = vector.broadcast %5 : vector<8x1xf32> to vector<8x128xf32>
    %61 = arith.mulf %59, %60 : vector<8x128xf32>
    %cst_14 = arith.constant dense<0.000000e+00> : vector<128xf32>
    %62 = vector.multi_reduction <add>, %61, %cst_14 [0] : vector<8x128xf32> to vector<128xf32>
    %63 = vector.shape_cast %62 : vector<128xf32> to vector<1x128xf32>
    %cst_15 = arith.constant 0.000000e+00 : f32
    %64 = vector.broadcast %cst_15 : f32 to vector<1x128xf32>
    %65 = arith.cmpf ogt, %63, %64 : vector<1x128xf32>
    %66 = tpu.iota {dimensions = array<i32: 1>} : vector<1x128xi32>
    %67 = vector.broadcast %28 : i32 to vector<1x128xi32>
    %68 = arith.addi %66, %67 : vector<1x128xi32>
    %c64_i32 = arith.constant 64 : i32
    %69 = vector.broadcast %c64_i32 : i32 to vector<1x128xi32>
    %70 = arith.cmpi slt, %68, %69 : vector<1x128xi32>
    %71 = arith.andi %65, %70 : vector<1x128xi1>
    %72 = vector.broadcast %38 : vector<1x128xf32> to vector<8x128xf32>
    %73 = vector.broadcast %14 : vector<8x1xf32> to vector<8x128xf32>
    %74 = arith.subf %72, %73 : vector<8x128xf32>
    %75 = vector.broadcast %39 : vector<1x128xf32> to vector<8x128xf32>
    %76 = vector.broadcast %17 : vector<8x1xf32> to vector<8x128xf32>
    %77 = arith.subf %75, %76 : vector<8x128xf32>
    %78 = arith.mulf %74, %74 : vector<8x128xf32>
    %79 = arith.mulf %77, %77 : vector<8x128xf32>
    %80 = arith.addf %78, %79 : vector<8x128xf32>
    %81 = math.sqrt %80 : vector<8x128xf32>
    %82 = vector.broadcast %40 : vector<1x128xf32> to vector<8x128xf32>
    %83 = arith.divf %81, %82 : vector<8x128xf32>
    %cst_16 = arith.constant 3.000000e+00 : f32
    %84 = vector.broadcast %cst_16 : f32 to vector<8x128xf32>
    %85 = arith.subf %83, %84 : vector<8x128xf32>
    %cst_17 = arith.constant 2.30258512 : f32
    %86 = vector.broadcast %cst_17 : f32 to vector<8x128xf32>
    %87 = arith.mulf %85, %86 : vector<8x128xf32>
    %88 = math.exp %87 : vector<8x128xf32>
    %89 = arith.subf %36, %34 : vector<1x128xf32>
    %90 = arith.subf %37, %35 : vector<1x128xf32>
    %91 = arith.mulf %89, %90 : vector<1x128xf32>
    %92 = vector.broadcast %34 : vector<1x128xf32> to vector<8x128xf32>
    %93 = vector.broadcast %8 : vector<8x1xf32> to vector<8x128xf32>
    %94 = arith.maximumf %92, %93 : vector<8x128xf32>
    %95 = vector.broadcast %35 : vector<1x128xf32> to vector<8x128xf32>
    %96 = vector.broadcast %9 : vector<8x1xf32> to vector<8x128xf32>
    %97 = arith.maximumf %95, %96 : vector<8x128xf32>
    %98 = vector.broadcast %36 : vector<1x128xf32> to vector<8x128xf32>
    %99 = vector.broadcast %10 : vector<8x1xf32> to vector<8x128xf32>
    %100 = arith.minimumf %98, %99 : vector<8x128xf32>
    %101 = vector.broadcast %37 : vector<1x128xf32> to vector<8x128xf32>
    %102 = vector.broadcast %11 : vector<8x1xf32> to vector<8x128xf32>
    %103 = arith.minimumf %101, %102 : vector<8x128xf32>
    %104 = arith.subf %100, %94 : vector<8x128xf32>
    %cst_18 = arith.constant 0.000000e+00 : f32
    %105 = vector.broadcast %cst_18 : f32 to vector<8x128xf32>
    %106 = arith.maximumf %104, %105 : vector<8x128xf32>
    %107 = arith.subf %103, %97 : vector<8x128xf32>
    %cst_19 = arith.constant 0.000000e+00 : f32
    %108 = vector.broadcast %cst_19 : f32 to vector<8x128xf32>
    %109 = arith.maximumf %107, %108 : vector<8x128xf32>
    %110 = arith.mulf %106, %109 : vector<8x128xf32>
    %111 = vector.broadcast %91 : vector<1x128xf32> to vector<8x128xf32>
    %112 = vector.broadcast %20 : vector<8x1xf32> to vector<8x128xf32>
    %113 = arith.addf %111, %112 : vector<8x128xf32>
    %114 = arith.subf %113, %110 : vector<8x128xf32>
    %cst_20 = arith.constant 9.99999997E-7 : f32
    %115 = vector.broadcast %cst_20 : f32 to vector<8x128xf32>
    %116 = arith.maximumf %114, %115 : vector<8x128xf32>
    %117 = arith.divf %110, %116 : vector<8x128xf32>
    %cst_21 = arith.constant 1.000000e-07 : f32
    %118 = vector.broadcast %cst_21 : f32 to vector<8x128xf32>
    %119 = arith.addf %117, %118 : vector<8x128xf32>
    %120 = math.log %119 : vector<8x128xf32>
    %cst_22 = arith.constant 0.000000e+00 : f32
    %121 = vector.broadcast %cst_22 : f32 to vector<8x128xf32>
    %122 = arith.subf %121, %120 : vector<8x128xf32>
    %cst_23 = arith.constant 3.000000e+00 : f32
    %123 = vector.broadcast %cst_23 : f32 to vector<8x128xf32>
    %124 = arith.mulf %122, %123 : vector<8x128xf32>
    %c0_24 = arith.constant 0 : index
    %c0_25 = arith.constant 0 : index
    %125 = arith.index_cast %28 : i32 to index
    %126 = vector.load %arg2[%c0_24, %c0_25, %125] : memref<1x4x128xf32, #tpu.memory_space<vmem>>, vector<1x4x128xf32>
    %127 = vector.shape_cast %126 : vector<1x4x128xf32> to vector<4x128xf32>
    %128 = arith.truncf %127 : vector<4x128xf32> to vector<4x128xbf16>
    %cst_26 = arith.constant dense<0.000000e+00> : vector<8x128xf32>
    %129 = tpu.matmul %26, %128, %cst_26 {dimension_numbers = #tpu.dot_dimension_numbers<[1], [0], [0], [1], [0, 0, 1, 1], [], []>} : vector<8x4xbf16>, vector<4x128xbf16>, vector<8x128xf32> -> vector<8x128xf32>
    %130 = math.absf %129 : vector<8x128xf32>
    %cst_27 = arith.constant 0.000000e+00 : f32
    %131 = vector.broadcast %cst_27 : f32 to vector<8x128xf32>
    %132 = arith.subf %131, %130 : vector<8x128xf32>
    %133 = math.exp %132 : vector<8x128xf32>
    %cst_28 = arith.constant 1.000000e+00 : f32
    %134 = vector.broadcast %cst_28 : f32 to vector<8x128xf32>
    %135 = arith.addf %134, %133 : vector<8x128xf32>
    %cst_29 = arith.constant 0.000000e+00 : f32
    %136 = vector.broadcast %cst_29 : f32 to vector<8x128xf32>
    %137 = arith.cmpf oge, %129, %136 : vector<8x128xf32>
    %cst_30 = arith.constant 1.000000e+00 : f32
    %138 = vector.broadcast %cst_30 : f32 to vector<8x128xf32>
    %139 = arith.select %137, %138, %133 : vector<8x128xi1>, vector<8x128xf32>
    %140 = arith.divf %139, %135 : vector<8x128xf32>
    %141 = math.log %135 : vector<8x128xf32>
    %cst_31 = arith.constant 0.000000e+00 : f32
    %142 = vector.broadcast %cst_31 : f32 to vector<8x128xf32>
    %143 = arith.maximumf %129, %142 : vector<8x128xf32>
    %144 = arith.mulf %129, %117 : vector<8x128xf32>
    %145 = arith.subf %143, %144 : vector<8x128xf32>
    %146 = arith.addf %145, %141 : vector<8x128xf32>
    %147 = arith.subf %117, %140 : vector<8x128xf32>
    %148 = arith.mulf %147, %147 : vector<8x128xf32>
    %149 = arith.mulf %146, %148 : vector<8x128xf32>
    %150 = arith.addf %149, %124 : vector<8x128xf32>
    %151 = arith.addf %150, %88 : vector<8x128xf32>
    %cst_32 = arith.constant 1.000000e+08 : f32
    %152 = vector.shape_cast %71 : vector<1x128xi1> to vector<1x128xi1>
    %153 = vector.broadcast %152 : vector<1x128xi1> to vector<8x128xi1>
    %154 = vector.broadcast %cst_32 : f32 to vector<8x128xf32>
    %155 = arith.select %153, %151, %154 : vector<8x128xi1>, vector<8x128xf32>
    %c0_33 = arith.constant 0 : index
    %156 = arith.index_cast %28 : i32 to index
    %157 = vector.load %arg11[%c0_33, %156] : memref<8x128xf32, #tpu.memory_space<vmem>>, vector<8x128xf32>
    tpu.vector_store %arg11[%c0_33, %156], %117 {strides = array<i32>} : memref<8x128xf32, #tpu.memory_space<vmem>>, vector<8x128xf32>,
    %c0_34 = arith.constant 0 : index
    %158 = arith.index_cast %28 : i32 to index
    %159 = vector.load %arg10[%c0_34, %158] : memref<8x128xf32, #tpu.memory_space<vmem>>, vector<8x128xf32>
    tpu.vector_store %arg10[%c0_34, %158], %155 {strides = array<i32>} : memref<8x128xf32, #tpu.memory_space<vmem>>, vector<8x128xf32>,
    %c1_i32 = arith.constant 1 : i32
    %c0_35 = arith.constant 0 : index
    %c0_36 = arith.constant 0 : index
    %160 = vector.load %arg11[%c0_35, %c0_36] : memref<8x128xf32, #tpu.memory_space<vmem>>, vector<8x128xf32>
    %c0_37 = arith.constant 0 : index
    %c0_38 = arith.constant 0 : index
    %161 = vector.load %arg10[%c0_37, %c0_38] : memref<8x128xf32, #tpu.memory_space<vmem>>, vector<8x128xf32>
    %162 = tpu.iota {dimensions = array<i32: 1>} : vector<1x128xi32>
    %cst_39 = arith.constant 0.000000e+00 : f32
    %163 = vector.broadcast %cst_39 : f32 to vector<8x1xf32>
    %c0_i32_40 = arith.constant 0 : i32
    %c13_i32 = arith.constant 13 : i32
    %164 = arith.addi %c0_i32_40, %c13_i32 : i32
    %c1_i32_41 = arith.constant 1 : i32
    %165:2 = scf.for %arg12 = %c0_i32_40 to %164 step %c1_i32_41 iter_args(%arg13 = %160, %arg14 = %163) -> (vector<8x128xf32>, vector<8x1xf32>)  : i32 {
      %cst_69 = arith.constant dense<0xFF800000> : vector<8xf32>
      %228 = vector.multi_reduction <maximumf>, %arg13, %cst_69 [1] : vector<8x128xf32> to vector<8xf32>
      %229 = vector.shape_cast %228 : vector<8xf32> to vector<8x1xf32>
      %230 = vector.broadcast %229 : vector<8x1xf32> to vector<8x128xf32>
      %231 = arith.cmpf oeq, %arg13, %230 : vector<8x128xf32>
      %c128_i32_70 = arith.constant 128 : i32
      %232 = vector.shape_cast %162 : vector<1x128xi32> to vector<1x128xi32>
      %233 = vector.broadcast %232 : vector<1x128xi32> to vector<8x128xi32>
      %234 = vector.broadcast %c128_i32_70 : i32 to vector<8x128xi32>
      %235 = arith.select %231, %233, %234 : vector<8x128xi1>, vector<8x128xi32>
      %cst_71 = arith.constant dense<2147483647> : vector<8xi32>
      %236 = vector.multi_reduction <minsi>, %235, %cst_71 [1] : vector<8x128xi32> to vector<8xi32>
      %237 = vector.shape_cast %236 : vector<8xi32> to vector<8x1xi32>
      %238 = vector.broadcast %162 : vector<1x128xi32> to vector<8x128xi32>
      %239 = vector.broadcast %237 : vector<8x1xi32> to vector<8x128xi32>
      %240 = arith.cmpi eq, %238, %239 : vector<8x128xi32>
      %241 = arith.addf %arg14, %229 : vector<8x1xf32>
      %cst_72 = arith.constant -1.000000e+00 : f32
      %242 = vector.broadcast %cst_72 : f32 to vector<8x128xf32>
      %243 = arith.select %240, %242, %arg13 : vector<8x128xi1>, vector<8x128xf32>
      scf.yield %243, %241 : vector<8x128xf32>, vector<8x1xf32>
    }
    %166 = arith.fptosi %165#1 : vector<8x1xf32> to vector<8x1xi32>
    %c1_i32_42 = arith.constant 1 : i32
    %167 = vector.broadcast %c1_i32_42 : i32 to vector<8x1xi32>
    %168 = arith.maxsi %166, %167 : vector<8x1xi32>
    %169 = tpu.iota {dimensions = array<i32: 0>} : vector<8x1xi32>
    %cst_43 = arith.constant dense<0x7F800000> : vector<128xf32>
    %170 = vector.multi_reduction <minimumf>, %161, %cst_43 [0] : vector<8x128xf32> to vector<128xf32>
    %171 = vector.shape_cast %170 : vector<128xf32> to vector<1x128xf32>
    %172 = vector.broadcast %171 : vector<1x128xf32> to vector<8x128xf32>
    %173 = arith.cmpf oeq, %161, %172 : vector<8x128xf32>
    %c8_i32 = arith.constant 8 : i32
    %174 = vector.shape_cast %169 : vector<8x1xi32> to vector<8x1xi32>
    %175 = vector.broadcast %174 : vector<8x1xi32> to vector<8x128xi32>
    %176 = vector.broadcast %c8_i32 : i32 to vector<8x128xi32>
    %177 = arith.select %173, %175, %176 : vector<8x128xi1>, vector<8x128xi32>
    %cst_44 = arith.constant dense<2147483647> : vector<128xi32>
    %178 = vector.multi_reduction <minsi>, %177, %cst_44 [0] : vector<8x128xi32> to vector<128xi32>
    %179 = vector.shape_cast %178 : vector<128xi32> to vector<1x128xi32>
    %180 = vector.broadcast %169 : vector<8x1xi32> to vector<8x128xi32>
    %181 = vector.broadcast %179 : vector<1x128xi32> to vector<8x128xi32>
    %182 = arith.cmpi eq, %180, %181 : vector<8x128xi32>
    %183 = arith.extui %182 : vector<8x128xi1> to vector<8x128xi32>
    %184 = arith.sitofp %183 : vector<8x128xi32> to vector<8x128xf32>
    %cst_45 = arith.constant 1.000000e-30 : f32
    %cst_46 = arith.constant 1.000000e+30 : f32
    %185 = vector.broadcast %cst_45 : f32 to vector<8x128xf32>
    %186 = arith.maximumf %185, %161 : vector<8x128xf32>
    %187 = vector.broadcast %cst_46 : f32 to vector<8x128xf32>
    %188 = arith.minimumf %187, %186 : vector<8x128xf32>
    %189 = tpu.bitcast %188 : vector<8x128xf32> -> vector<8x128xi32>
    %c-128_i32 = arith.constant -128 : i32
    %190 = vector.broadcast %c-128_i32 : i32 to vector<8x128xi32>
    %191 = arith.andi %189, %190 : vector<8x128xi32>
    %192 = vector.broadcast %162 : vector<1x128xi32> to vector<8x128xi32>
    %193 = arith.ori %191, %192 : vector<8x128xi32>
    %194 = tpu.bitcast %193 : vector<8x128xi32> -> vector<8x128xf32>
    %cst_47 = arith.constant 0.000000e+00 : f32
    %195 = vector.broadcast %cst_47 : f32 to vector<8x128xf32>
    %c0_i32_48 = arith.constant 0 : i32
    %c13_i32_49 = arith.constant 13 : i32
    %196 = arith.addi %c0_i32_48, %c13_i32_49 : i32
    %c1_i32_50 = arith.constant 1 : i32
    %197:2 = scf.for %arg12 = %c0_i32_48 to %196 step %c1_i32_50 iter_args(%arg13 = %194, %arg14 = %195) -> (vector<8x128xf32>, vector<8x128xf32>)  : i32 {
      %cst_69 = arith.constant dense<0x7F800000> : vector<8xf32>
      %228 = vector.multi_reduction <minimumf>, %arg13, %cst_69 [1] : vector<8x128xf32> to vector<8xf32>
      %229 = vector.shape_cast %228 : vector<8xf32> to vector<8x1xf32>
      %230 = vector.broadcast %229 : vector<8x1xf32> to vector<8x128xf32>
      %231 = arith.cmpf oeq, %arg13, %230 : vector<8x128xf32>
      %232 = vector.broadcast %arg12 : i32 to vector<8x1xi32>
      %233 = arith.cmpi slt, %232, %168 : vector<8x1xi32>
      %234 = arith.andi %233, %7 : vector<8x1xi1>
      %235 = vector.broadcast %234 : vector<8x1xi1> to vector<8x128xi1>
      %236 = arith.andi %231, %235 : vector<8x128xi1>
      %cst_70 = arith.constant 1.000000e+00 : f32
      %237 = vector.broadcast %cst_70 : f32 to vector<8x128xf32>
      %238 = arith.select %236, %237, %arg14 : vector<8x128xi1>, vector<8x128xf32>
      %cst_71 = arith.constant 3.000000e+38 : f32
      %239 = vector.broadcast %cst_71 : f32 to vector<8x128xf32>
      %240 = arith.select %231, %239, %arg13 : vector<8x128xi1>, vector<8x128xf32>
      scf.yield %240, %238 : vector<8x128xf32>, vector<8x128xf32>
    }
    %c13_i32_51 = arith.constant 13 : i32
    %cst_52 = arith.constant dense<0.000000e+00> : vector<128xf32>
    %198 = vector.multi_reduction <add>, %197#1, %cst_52 [0] : vector<8x128xf32> to vector<128xf32>
    %199 = vector.shape_cast %198 : vector<128xf32> to vector<1x128xf32>
    %cst_53 = arith.constant 1.000000e+00 : f32
    %200 = vector.broadcast %cst_53 : f32 to vector<1x128xf32>
    %201 = arith.cmpf ogt, %199, %200 : vector<1x128xf32>
    %202 = vector.shape_cast %201 : vector<1x128xi1> to vector<1x128xi1>
    %203 = vector.broadcast %202 : vector<1x128xi1> to vector<8x128xi1>
    %204 = arith.select %203, %184, %197#1 : vector<8x128xi1>, vector<8x128xf32>
    %205 = arith.mulf %204, %160 : vector<8x128xf32>
    %cst_54 = arith.constant dense<0.000000e+00> : vector<128xf32>
    %206 = vector.multi_reduction <add>, %205, %cst_54 [0] : vector<8x128xf32> to vector<128xf32>
    %207 = vector.shape_cast %206 : vector<128xf32> to vector<1x128xf32>
    %c0_55 = arith.constant 0 : index
    %c0_56 = arith.constant 0 : index
    %c0_57 = arith.constant 0 : index
    %208 = vector.load %arg6[%c0_55, %c0_56, %c0_57] : memref<1x4x8xf32, #tpu.memory_space<vmem>>, vector<1x4x8xf32>
    %209 = vector.shape_cast %208 : vector<1x4x8xf32> to vector<4x8xf32>
    %c0_58 = arith.constant 0 : index
    %c0_59 = arith.constant 0 : index
    %c0_60 = arith.constant 0 : index
    %210 = vector.load %arg7[%c0_58, %c0_59, %c0_60] : memref<1x1x8xf32, #tpu.memory_space<vmem>>, vector<1x1x8xf32>
    %211 = vector.shape_cast %210 : vector<1x1x8xf32> to vector<1x8xf32>
    %cst_61 = arith.constant 1.000000e+00 : f32
    %212 = vector.broadcast %cst_61 : f32 to vector<1x8xf32>
    %cst_62 = arith.constant 0.000000e+00 : f32
    %213 = vector.broadcast %cst_62 : f32 to vector<2x8xf32>
    %214 = tpu.concatenate %209, %211, %212, %213 in 0 : vector<4x8xf32>, vector<1x8xf32>, vector<1x8xf32>, vector<2x8xf32> -> vector<8x8xf32>
    %cst_63 = arith.constant dense<0.000000e+00> : vector<8x128xf32>
    %215 = tpu.matmul %214, %204, %cst_63 {dimension_numbers = #tpu.dot_dimension_numbers<[1], [0], [0], [1], [0, 0, 1, 1], [], []>} : vector<8x8xf32>, vector<8x128xf32>, vector<8x128xf32> -> vector<8x128xf32>
    %216 = vector.extract_strided_slice %215 {offsets = [5, 0], sizes = [1, 128], strides = [1, 1]} : vector<8x128xf32> to vector<1x128xf32>
    %cst_64 = arith.constant 0.000000e+00 : f32
    %217 = vector.broadcast %cst_64 : f32 to vector<1x128xf32>
    %218 = arith.cmpf ogt, %216, %217 : vector<1x128xf32>
    %219 = vector.extract_strided_slice %215 {offsets = [4, 0], sizes = [1, 128], strides = [1, 1]} : vector<8x128xf32> to vector<1x128xf32>
    %cst_65 = arith.constant 4.000000e+00 : f32
    %220 = vector.broadcast %cst_65 : f32 to vector<1x128xf32>
    %221 = arith.select %218, %219, %220 : vector<1x128xi1>, vector<1x128xf32>
    %222 = vector.extract_strided_slice %215 {offsets = [0, 0], sizes = [4, 128], strides = [1, 1]} : vector<8x128xf32> to vector<4x128xf32>
    %223 = vector.extract_strided_slice %215 {offsets = [6, 0], sizes = [2, 128], strides = [1, 1]} : vector<8x128xf32> to vector<2x128xf32>
    %224 = tpu.concatenate %222, %207, %221, %223 in 0 : vector<4x128xf32>, vector<1x128xf32>, vector<1x128xf32>, vector<2x128xf32> -> vector<8x128xf32>
    %c0_66 = arith.constant 0 : index
    %c0_67 = arith.constant 0 : index
    %c0_68 = arith.constant 0 : index
    %225 = vector.load %arg9[%c0_66, %c0_67, %c0_68] : memref<1x8x128xf32, #tpu.memory_space<vmem>>, vector<1x8x128xf32>
    %226 = vector.shape_cast %225 : vector<1x8x128xf32> to vector<8x128xf32>
    %227 = vector.shape_cast %224 : vector<8x128xf32> to vector<1x8x128xf32>
    tpu.vector_store %arg9[%c0_66, %c0_67, %c0_68], %227 {strides = array<i32>} : memref<1x8x128xf32, #tpu.memory_space<vmem>>, vector<1x8x128xf32>,
    return
  }
  func.func @transform_0(%arg0: i32) -> (i32, i32, i32) {
    %c0_i32 = arith.constant 0 : i32
    %c0_i32_0 = arith.constant 0 : i32
    %c0_i32_1 = arith.constant 0 : i32
    return %arg0, %c0_i32, %c0_i32_0 : i32, i32, i32
  }
  func.func @transform_1(%arg0: i32) -> (i32, i32, i32) {
    %c0_i32 = arith.constant 0 : i32
    %c0_i32_0 = arith.constant 0 : i32
    %c0_i32_1 = arith.constant 0 : i32
    return %arg0, %c0_i32, %c0_i32_0 : i32, i32, i32
  }
  func.func @transform_2(%arg0: i32) -> (i32, i32) {
    %c0_i32 = arith.constant 0 : i32
    %c0_i32_0 = arith.constant 0 : i32
    %c0_i32_1 = arith.constant 0 : i32
    return %c0_i32, %c0_i32_0 : i32, i32
  }
  func.func @transform_3(%arg0: i32) -> (i32, i32, i32) {
    %c0_i32 = arith.constant 0 : i32
    %c0_i32_0 = arith.constant 0 : i32
    %c0_i32_1 = arith.constant 0 : i32
    return %arg0, %c0_i32, %c0_i32_0 : i32, i32, i32
  }
  func.func @transform_4(%arg0: i32) -> (i32, i32, i32) {
    %c0_i32 = arith.constant 0 : i32
    %c0_i32_0 = arith.constant 0 : i32
    %c0_i32_1 = arith.constant 0 : i32
    return %arg0, %c0_i32, %c0_i32_0 : i32, i32, i32
  }
  func.func @transform_5(%arg0: i32) -> (i32, i32, i32) {
    %c0_i32 = arith.constant 0 : i32
    %c0_i32_0 = arith.constant 0 : i32
    %c0_i32_1 = arith.constant 0 : i32
    return %arg0, %c0_i32, %c0_i32_0 : i32, i32, i32
  }
  func.func @transform_6(%arg0: i32) -> (i32, i32, i32) {
    %c0_i32 = arith.constant 0 : i32
    %c0_i32_0 = arith.constant 0 : i32
    %c0_i32_1 = arith.constant 0 : i32
    return %arg0, %c0_i32, %c0_i32_0 : i32, i32, i32
  }
  func.func @transform_7(%arg0: i32) -> (i32, i32, i32) {
    %c0_i32 = arith.constant 0 : i32
    %c0_i32_0 = arith.constant 0 : i32
    %c0_i32_1 = arith.constant 0 : i32
    return %arg0, %c0_i32, %c0_i32_0 : i32, i32, i32
  }
  func.func @transform_8(%arg0: i32) -> (i32, i32, i32) {
    %c0_i32 = arith.constant 0 : i32
    %c0_i32_0 = arith.constant 0 : i32
    %c0_i32_1 = arith.constant 0 : i32
    return %arg0, %c0_i32, %c0_i32_0 : i32, i32, i32
  }
}

</mosaic_0001>

<bundles_post_ra>
// kernel: tpu_custom_call.1
= control target key start
LH: loop header
LB: loop body
LE: loop exit
PB: predicated region body
PF: predicated region fallthrough
CT: control target
= control target key end

     0   :  { %s1569_s0 = inlined_call_operand.vmem [shape: f32[2,4,128], index: 0, kind: input, shape index: {}]   ;;  %s1570_s1 = inlined_call_operand.vmem [shape: f32[2,4,128], index: 1, kind: input, shape index: {}]   ;;  %s1571_s2 = inlined_call_operand.vmem [shape: f32[4,128], index: 2, kind: input, shape index: {}]   ;;  %s1572_s3 = inlined_call_operand.vmem [shape: s32[2,8,1], index: 3, kind: input, shape index: {}]   ;;  %s1573_s4 = inlined_call_operand.vmem [shape: f32[2,8,4], index: 4, kind: input, shape index: {}]   ;;  %s1574_s5 = inlined_call_operand.vmem [shape: f32[2,4,8], index: 5, kind: input, shape index: {}]   ;;  %s1575_s6 = inlined_call_operand.vmem [shape: f32[2,1,8], index: 6, kind: input, shape index: {}]   ;;  %s1576_s7 = inlined_call_operand.vmem [shape: f32[2,8,1], index: 7, kind: input, shape index: {}]   ;;  %s1577_s8 = inlined_call_operand.hbm [shape: f32[2,8,128], index: 8, kind: output, shape index: {}]  }
   0x1   :  { %1578 = sst [smem:[#allocation7_spill]] %s1572_s3 }
   0x2   :  { %13 = vsyncpa [#allocation5], 0 }
   0x3   :  { %15 = vsyncpa [#allocation5 + $0x1], 0  ;;  %s1332_s27 = smov 0   ;;  %s1334_s28 = smov 0  }
   0x4   :  { %s1336_s29 = smov 0   ;;  %s1338_s30 = smov 0  }
   0x5 LB: > { %s1353_s9 = sadd.s32 4294967295, %s1250_s30   ;;  %s1002_s10 = sadd.s32 4294967294, %s1250_s30   ;;  %s1250_s30 = sphi %s1338_s30, %s1586_s30   ;;  %s1246_s29 = sphi %s1336_s29, %s1585_s29   ;;  %s1242_s28 = sphi %s1334_s28, %s1584_s28   ;;  %s1238_s27 = sphi %s1332_s27, %s1583_s27  }
   0x6   : > { %s1357_s11 = sadd.s32 1, %s1250_s30   ;;  %s231_s12 = sadd.s32 1, %s1246_s29 }
   0x7   : > { %s228_s13 = ssub.s32 %s1250_s30, %s1357_s11  ;;  %p241_p0 = scmp.ne.s32.totalorder %s1246_s29, %s1242_s28 }
   0x8   : > { %p229_p1 = scmp.eq.s32.totalorder %s228_s13, 0  ;;  %p242_p2 = scmp.eq.s32.totalorder %s1353_s9, 1 }
   0x9   : > { %p247_p3 = scmp.ne.s32.totalorder %s1242_s28, %s1238_s27  ;;  %p248_p4 = scmp.eq.s32.totalorder %s1002_s10, 1 }
   0xa   : > { %s1368_s14 = scalar_select %p229_p1, %s1246_s29, %s231_s12  }
   0xb   : > { %p1370_p5 = por %p242_p2, %p241_p0  ;;  %p1374_p6 = por %p248_p4, %p247_p3 }
   0xc   : > { %p1005_p7 = scmp.ge.s32.totalorder %s1250_s30, 1  ;;  %p317_p8 = scmp.lt.s32.totalorder %s1250_s30, 3 }
   0xe   : > { %p318_p9 = pnand %p1005_p7, %p317_p8 }
   0xf   : > { %p373_p10 = scmp.lt.s32.totalorder (!%p318_p9), %s1353_s9, 1  ;;  %v1276_v0 = vmov (!%p318_p9), 0   ;;  %v1277_v1 = vmov (!%p318_p9), 0.0   ;;  %s1581_s3 = sld [smem:[#allocation7_spill]] (!%p318_p9)  ;;  %v420_v2 = vlaneseq (!%p318_p9)  ;;  %vm571_vm0 = vcmask (!%p318_p9), 1041408  }
  0x10   : > { %321 = sbr.rel (%p318_p9) target bundleno = 1290 (0x50a), region = 52  ;;  %1138 = vset.pattern.permute.xlu0 (!%p318_p9), %v1276_v0  ;;  %1028 = vmatprep.subr.bf16.mxu0 (!%p318_p9), %v1277_v1  ;;  %s1278_s13 = smov (!%p318_p9), 126   ;;  %vm1279_vm1 = vmmov (!%p318_p9), 0   ;;  %v1281_v12 = vmov (!%p318_p9), 1   ;;  %v1282_v15 = vmov (!%p318_p9), 2   ;;  %vm567_vm4 = vcmask (!%p318_p9), 31744  }
  0x11   : > { %v1407_v5 = vshrl.u32 (!%p318_p9), %v420_v2, 7  ;;  %s370_s23 = sand.u32 (!%p318_p9), 1, %s1242_s28   ;;  %1030 = vmatprep.mubr.msk.bf16.mxu0 (!%p318_p9), %vm1279_vm1, %v1277_v1  ;;  %s1280_s19 = smov (!%p318_p9), 2   ;;  %1139 = vset.pattern.permute.xlu1 (!%p318_p9), %v1281_v12  ;;  %v1439_v19 = vand.u32 (!%p318_p9), 127, %v420_v2  ;;  %v1284_v34 = vmov (!%p318_p9), 3  }
  0x12   : > { %v430_v55 = vld [vmem:[%s1571_s2] sm:$0xf] (!%p318_p9) }
  0x13   : > { %v433_v10 = vsub.s32 (!%p318_p9), 0, %v1407_v5  ;;  %v1434_v13 = vsub.s32 (!%p318_p9), 2, %v1407_v5  ;;  %v442_v27 = vsub.s32 (!%p318_p9), 1, %v1407_v5  ;;  %v538_v28 = vsub.s32 (!%p318_p9), 3, %v1407_v5 }
  0x14   : > { %vm480_vm9 = vcmp.lt.s32.totalorder (!%p318_p9), %v1439_v19, 64 }
  0x15   : > { %v434_v59 = vrot.slane (!%p318_p9), %v430_v55, %v433_v10  ;;  %v443_v60 = vrot.slane (!%p318_p9), %v430_v55, %v442_v27 }
  0x17   : > { %s1384_s17 = scalar_select %p373_p10, %s1353_s9, 1 }
  0x19   : > { %s1387_s18 = sshll.u32 %s1384_s17, 3  ;;  %s1404_s12 = sshll.u32 %s1384_s17, 2 }
  0x1a   : > { %s384_s24 = scalar_lea.vmem %s1581_s3, %s1387_s18  ;;  %s388_s10 = scalar_lea.vmem %s1573_s4, %s1387_s18 }
  0x1b   : > { %v1401_v3 = vld [vmem:[%s388_s10] sm:$0xff]  ;;  %s380_s22 = scalar_lea.vmem %s1570_s1, %s1404_s12  ;;  %s376_s26 = scalar_lea.vmem %s1569_s0, %s1404_s12 }
  0x1c   : > { %v402_v4 = vld [vmem:[%s384_s24] sm:$0xff]  ;;  %406 = vrot.lane.b32.xlu1 %v1401_v3, %s1278_s13  ;;  %s1420_s10 = sshll.u32 %s370_s23, 3  ;;  %s392_s13 = scalar_lea.vmem %s1574_s5, %s1404_s12 }
  0x1d   : > { %423 = vperm.xlu0 %1138, %v402_v4   ;;  %v565_v6 = vld [vmem:[%s380_s22] sm:$0xf]  ;;  %s399_s20 = scalar_lea.vmem %s1576_s7, %s1387_s18  ;;  %s1283_s22 = smov 127  }
  0x1e   : > { %v566_v7 = vpack.c.bf16 %v565_v6, %v565_v6  ;;  %v429_v8 = vld [vmem:[%s376_s26] sm:$0xf]  ;;  %s372_s24 = scalar_lea.vmem [#allocation4], %s1420_s10  ;;  %s1484_s26 = smov 0  }
  0x1f   : > { %v524_v11 = vrot.slane %v429_v8, %v433_v10  ;;  %v534_v14 = vrot.slane %v429_v8, %v1434_v13  ;;  %v1445_v21 = vld [vmem:[%s399_s20] sm:$0xff]  ;;  %v529_v30 = vrot.slane %v429_v8, %v442_v27  ;;  %v539_v33 = vrot.slane %v429_v8, %v538_v28 }
  0x20   : > { %v573_v9 = vsel %vm571_vm0, %v566_v7, 0  ;;  %vm404_vm3 = vcmp.gt.f32.partialorder %v1445_v21, 0.0  ;;  %v514_v36 = vrot.slane %v429_v8, 6 }
  0x21   : > { %411 = vrot.lane.b32.xlu0 %v1401_v3, %s1280_s19  ;;  %1029 = vmatpush3.bf16.msra.mxu0 %v573_v9 }
  0x22   : > { %v516_v37 = vsub.f32 %v429_v8, %v514_v36  ;;  %v506_v8 = vrot.slane %v430_v55, %v1434_v13 }
  0x24   : > { %v518_v38 = vrot.slane %v516_v37, 1 }
  0x25   : > { %436 = vperm.xlu0 %1138, %v1401_v3  }
  0x26   : > { %v520_v39 = vmul.f32 %v518_v38, %v516_v37 }
  0x28   : > { %v549_v42 = vrot.slane %v520_v39, %v1434_v13 }
  0x29   : > { %1140 = vset.pattern.permute.xlu0 %v1282_v15 }
  0x2a   : > { %450 = vperm.xlu0 %1140, %v1401_v3  }
  0x2e   : > { %1143 = vset.pattern.permute.xlu0 %v1281_v12 }
  0x8e   : > { %v407_v16 = vpop.permute.xlu1 %406 }
  0x8f   : > { %v409_v17 = vadd.f32 %v407_v16, %v1401_v3 }
  0x91   : > { %v410_v18 = vmul.f32 0.5, %v409_v17 }
  0x93   : > { %489 = vperm.xlu0 %1143, %v410_v18  }
  0x97   : > { %1146 = vset.pattern.permute.xlu0 %v1282_v15 }
  0x9c   : > { %v424_v20 = vpop.permute.xlu0 %423 }
  0x9d   : > { %vm425_vm2 = vcmp.eq.s32.totalorder %v1439_v19, %v424_v20 }
  0x9e   : > { %v1013_v22 = vsel %vm425_vm2, 1.0, %v1277_v1 }
  0x9f   : > { %v428_v23 = vpack.c.bf16 %v1013_v22, %v1013_v22 }
  0xa0   : > { %v412_v24 = vpop.permute.xlu0 %411 }
  0xa1   : > { %v414_v25 = vsub.f32 %v1401_v3, %v412_v24  ;;  %1031 = vmatmul.mubr.msk.bf16.vlgmr.msra.gmra.mrb[0].mxu0 %vm567_vm4, %v428_v23 }
  0xa3   : > { %416 = vrot.lane.b32.xlu1 %v414_v25, %s1283_s22 }
  0xa4   : > { %v1451_v26 = vpop.permute.xlu0 %436 }
  0xa5   : > { %v525_v31 = vmax.f32 %v524_v11, %v1451_v26  ;;  %v439_v12 = vsub.f32 %v434_v59, %v1451_v26 }
  0xa7   : > { %445 = vperm.xlu1 %1139, %v1401_v3  }
  0xa9   : > { %v451_v29 = vpop.permute.xlu0 %450 }
  0xaa   : > { %v535_v32 = vmin.f32 %v534_v14, %v451_v29  ;;  %v453_v6 = vsub.f32 %v451_v29, %v434_v59 }
  0xab   : > { %1141 = vset.pattern.permute.xlu1 %v1284_v34 }
  0xac   : > { %v541_v35 = vsub.f32 %v535_v32, %v525_v31  ;;  %455 = vperm.xlu1 %1141, %v1401_v3  }
  0xae   : > { %v542_v48 = vmax.f32 %v541_v35, 0.0 }
  0xb0   : > { %1142 = vset.pattern.permute.xlu1 %v1276_v0 }
  0xb1   : > { %484 = vperm.xlu1 %1142, %v410_v18  }
  0xb5   : > { %1144 = vset.pattern.permute.xlu1 %v1282_v15 }
 0x112   : > { %v490_v58 = vpop.permute.xlu0 %489 }
 0x113   : > { %v492_v62 = vsub.f32 %v443_v60, %v490_v58 }
 0x115   : > { %v417_v40 = vpop.permute.xlu1 %416  ;;  %v494_v2 = vmul.f32 %v492_v62, %v492_v62 }
 0x116   : > { %v419_v41 = vmul.f32 %v417_v40, %v414_v25 }
 0x118   : > { %552 = vperm.xlu1 %1144, %v419_v41  }
 0x11c   : > { %1145 = vset.pattern.permute.xlu1 %v1276_v0 }
 0x11d   : > { %467 = vperm.xlu1 %1145, %v1445_v21  }
 0x126   : > { %v446_v43 = vpop.permute.xlu1 %445 }
 0x127   : > { %v530_v44 = vmax.f32 %v529_v30, %v446_v43  ;;  %v448_v9 = vsub.f32 %v443_v60, %v446_v43 }
 0x129   : > { %v459_v16 = vmin.f32 %v439_v12, %v448_v9 }
 0x12b   : > { %v456_v45 = vpop.permute.xlu1 %455 }
 0x12c   : > { %v540_v46 = vmin.f32 %v539_v33, %v456_v45  ;;  %v458_v7 = vsub.f32 %v456_v45, %v443_v60 }
 0x12e   : > { %v543_v47 = vsub.f32 %v540_v46, %v530_v44  ;;  %v460_v14 = vmin.f32 %v453_v6, %v458_v7 }
 0x130   : > { %v544_v49 = vmax.f32 %v543_v47, 0.0  ;;  %v485_v57 = vpop.permute.xlu1 %484  ;;  %v461_v22 = vmin.f32 %v459_v16, %v460_v14 }
 0x131   : > { %v487_v61 = vsub.f32 %v434_v59, %v485_v57 }
 0x132   : > { %v545_v50 = vmul.f32 %v544_v49, %v542_v48  ;;  %vm462_vm6 = vcmp.gt.f32.partialorder %v461_v22, 0.0 }
 0x133   : > { %v493_v0 = vmul.f32 %v487_v61, %v487_v61  ;;  %v1014_v26 = vsel %vm462_vm6, 1.0, %v1277_v1 }
 0x135   : > { %v495_v4 = vadd.f32 %v494_v2, %v493_v0  ;;  %v1252_v0 = vmov 0.0  }
 0x137   : > { %vm498_vm5 = vcmp.eq.f32.partialorder %v495_v4, inf  ;;  %v501_v25 = vand.u32 2147483648, %v495_v4  ;;  %vm500_vm7 = vcmp.eq.f32.partialorder %v495_v4, 0.0 }
 0x174   : > { %v1462_v51 = vpop.f32.mrb[0].mxu0 }
 0x175   : > { %v1032_v52 = vpop.f32.mrb[1].mxu0  ;;  %v615_v56 = vand.u32 2147483647, %v1462_v51  ;;  %vm620_vm8 = vcmp.ge.f32.partialorder %v1462_v51, 0.0  ;;  %v626_v41 = vmax.f32 %v1462_v51, 0.0 }
 0x176   : > { %v612_v53 = vpop.f32.mrb[2].mxu0 }
 0x177   : > { %v1033_v54 = vpop.f32.mrb[3].mxu0  ;;  %v616_v63 = vsub.f32 0.0, %v615_v56 }
 0x179   : > { %v617_v3 = vmul.f32 1.442695, %v616_v63 }
 0x17b   : > { %1147 = vpow2.f32 %v617_v3 }
 0x17c   : > { %1149 = vrsqrt.f32 %v495_v4 }
 0x17d   : > { %1151 = vrcp.f32 %v506_v8 }
 0x185   : > { %v1148_v11 = vpop.eup %1147 }
 0x186   : > { %v1150_v15 = vpop.eup %1149  ;;  %v619_v17 = vadd.f32 1.0, %v1148_v11  ;;  %v621_v35 = vsel %vm620_vm8, 1.0, %v1148_v11 }
 0x187   : > { %v497_v23 = vmul.f32 %v1150_v15, %v495_v4  ;;  %v1152_v28 = vpop.eup %1151 }
 0x188   : > { %1153 = vrcp.f32 %v619_v17 }
 0x189   : > { %v499_v13 = vsel %vm498_vm5, %v495_v4, %v497_v23 }
 0x18a   : > { %v502_v29 = vsel %vm500_vm7, %v501_v25, %v499_v13 }
 0x18b   : > { %v508_v31 = vmul.f32 %v1152_v28, %v502_v29 }
 0x18d   : > { %v1015_v38 = vadd.f32 -3.0, %v508_v31 }
 0x18f   : > { %v510_v47 = vmul.f32 2.3025851, %v1015_v38 }
 0x191   : > { %v511_v53 = vmul.f32 1.442695, %v510_v47 }
 0x192   : > { %v1154_v32 = vpop.eup %1153 }
 0x193   : > { %v623_v36 = vmul.f32 %v1154_v32, %v621_v35 }
 0x197   : > { %v553_v10 = vpop.permute.xlu1 %552 }
 0x198   : > { %v555_v18 = vadd.f32 %v553_v10, %v549_v42 }
 0x19a   : > { %v556_v20 = vsub.f32 %v555_v18, %v545_v50 }
 0x19c   : > { %v557_v24 = vmax.f32 %v556_v20, 1e-06  ;;  %v468_v27 = vpop.permute.xlu1 %467 }
 0x19d   : > { %v470_v30 = vmul.f32 %v1014_v26, %v468_v27 }
 0x19e   : > { %1155 = vrcp.f32 %v557_v24 }
 0x19f   : > { %1157 = vlog2.f32 %v619_v17  ;;  %v471_v33 = vrot.slane %v470_v30, 4 }
 0x1a1   : > { %v472_v40 = vadd.f32 %v471_v33, %v470_v30 }
 0x1a3   : > { %v473_v48 = vrot.slane %v472_v40, 2 }
 0x1a5   : > { %v474_v54 = vadd.f32 %v473_v48, %v472_v40 }
 0x1a7   : > { %v475_v55 = vrot.slane %v474_v54, 1 }
 0x1a8   : > { %v1156_v34 = vpop.eup %1155 }
 0x1a9   : > { %v1474_v37 = vmul.f32 %v1156_v34, %v545_v50   ;;  %v1158_v39 = vpop.eup %1157  ;;  %v476_v59 = vadd.f32 %v475_v55, %v474_v54 }
 0x1aa   : > { %v625_v45 = vmul.f32 0.6931472, %v1158_v39 }
 0x1ab   : > { %v560_v42 = vadd.f32 1e-07, %v1474_v37  ;;  %v627_v43 = vmul.f32 %v1462_v51, %v1474_v37  ;;  %v630_v44 = vsub.f32 %v1474_v37, %v623_v36  ;;  %vm477_vm10 = vcmp.gt.f32.partialorder %v476_v59, 0.0 }
 0x1ac   : > { %vm481_vm11 = vmand %vm477_vm10, %vm480_vm9  ;;  %v1256_v2 = vmov %v1474_v37  }
 0x1ad   : > { %1159 = vlog2.f32 %v560_v42  ;;  %v628_v46 = vsub.f32 %v626_v41, %v627_v43  ;;  %v631_v50 = vmul.f32 %v630_v44, %v630_v44 }
 0x1ae   : > { %1161 = vpow2.f32 %v511_v53 }
 0x1af   : > { %v629_v49 = vadd.f32 %v628_v46, %v625_v45 }
 0x1b1   : > { %v632_v52 = vmul.f32 %v631_v50, %v629_v49 }
 0x1b7   : > { %v1160_v56 = vpop.eup %1159 }
 0x1b8   : > { %v562_v57 = vmul.f32 0.6931472, %v1160_v56  ;;  %v1162_v61 = vpop.eup %1161 }
 0x1ba   : > { %v563_v58 = vsub.f32 0.0, %v562_v57 }
 0x1bc   : > { %v564_v51 = vmul.f32 3.0, %v563_v58 }
 0x1be   : > { %v633_v60 = vadd.f32 %v632_v52, %v564_v51 }
 0x1c0   : > { %v634_v62 = vadd.f32 %v1162_v61, %v633_v60 }
 0x1c2   : > { %v637_v63 = vsel %vm481_vm11, %v634_v62, 1e+08 }
 0x1c3 LB: >> { %650 = vmax.xlane.f32.xlu0 %v1258_v2  ;;  %s647_s26 = sadd.s32 1, %s1262_s26   ;;  %s1262_s26 = sphi %s1484_s26, %s647_s26   ;;  %v1258_v2 = vphi %v1256_v2, %v670_v2   ;;  %v1254_v0 = vphi %v1252_v0, %v1253_v0  }
 0x1c4   : >> { %p644_p11 = scmp.ge.s32.totalorder %s647_s26, 13  }
 0x1c5   : > { %v676_v22 = vrot.slane (%p644_p11), %v637_v63, 4  ;;  %v696_v23 = vmax.f32 (%p644_p11), %v637_v63, 1e-30  ;;  %v1264_v42 = vmov (%p644_p11), 0.0   ;;  %s1272_s19 = smov (%p644_p11), 0  }
 0x1c7   : > { %v677_v25 = vmin.f32 (%p644_p11), %v637_v63, %v676_v22  ;;  %v697_v13 = vmin.f32 (%p644_p11), %v696_v23, 1e+30 }
 0x1c9   : > { %v678_v27 = vrot.slane (%p644_p11), %v677_v25, 2  ;;  %v699_v26 = vand.u32 (%p644_p11), 4294967168, %v697_v13 }
 0x1cb   : > { %v679_v29 = vmin.f32 (%p644_p11), %v677_v25, %v678_v27  ;;  %v700_v30 = vor.u32 (%p644_p11), %v699_v26, %v1439_v19  }
 0x1cd   : > { %v680_v31 = vrot.slane (%p644_p11), %v679_v29, 1 }
 0x1cf   : > { %v681_v32 = vmin.f32 (%p644_p11), %v679_v29, %v680_v31 }
 0x1d1   : > { %vm682_vm0 = vcmp.eq.f32.partialorder (%p644_p11), %v637_v63, %v681_v32 }
 0x1d2   : > { %v683_v33 = vsel (%p644_p11), %vm682_vm0, %v1407_v5, 8 }
 0x1d3   : > { %v684_v34 = vrot.slane (%p644_p11), %v683_v33, 4 }
 0x1d5   : > { %vm685_vm2 = vcmp.lt.s32.totalorder (%p644_p11), %v683_v33, %v684_v34 }
 0x1d6   : > { %v686_v35 = vsel (%p644_p11), %vm685_vm2, %v683_v33, %v684_v34 }
 0x1d7   : > { %v687_v36 = vrot.slane (%p644_p11), %v686_v35, 2 }
 0x1d9   : > { %vm688_vm4 = vcmp.lt.s32.totalorder (%p644_p11), %v686_v35, %v687_v36 }
 0x1da   : > { %v689_v38 = vsel (%p644_p11), %vm688_vm4, %v686_v35, %v687_v36 }
 0x1db   : > { %v690_v39 = vrot.slane (%p644_p11), %v689_v38, 1 }
 0x1dd   : > { %vm691_vm5 = vcmp.lt.s32.totalorder (%p644_p11), %v689_v38, %v690_v39 }
 0x1de   : > { %v692_v40 = vsel (%p644_p11), %vm691_vm5, %v689_v38, %v690_v39 }
 0x1df   : > { %vm693_vm6 = vcmp.eq.s32.totalorder (%p644_p11), %v1407_v5, %v692_v40 }
 0x1e0   : > { %v1017_v41 = vsel (%p644_p11), %vm693_vm6, 1.0, %v1277_v1 }
 0x250   : >> { %v651_v3 = vpop.xlane.xlu0 %650 }
 0x251   : >> { %vm652_vm12 = vcmp.eq.f32.partialorder %v1258_v2, %v651_v3  ;;  %v669_v4 = vadd.f32 %v1254_v0, %v651_v3  }
 0x252   : >> { %v653_v6 = vsel %vm652_vm12, %v1439_v19, 128 }
 0x253   : >> { %v655_v7 = vshra.s32 %v653_v6, 16  ;;  %v654_v9 = vand.u32 65535, %v653_v6  ;;  %v1253_v0 = vmov %v669_v4   ;;  %v1039_v20 = vtrunc.f32 (%p644_p11), %v669_v4 }
 0x255   : >> { %v657_v8 = vcvt.s32.f32 %v655_v7  ;;  %v656_v12 = vcvt.s32.f32 %v654_v9  ;;  %v1040_v24 = vcvt.f32.s32 (%p644_p11), %v1039_v20 }
 0x257   : >> { %658 = vmin.xlane.f32.xlu0 %v657_v8  ;;  %vm672_vm15 = vcmp.gt.s32.totalorder (%p644_p11), %v1040_v24, 1 }
 0x258   : > { %v673_v28 = vsel (%p644_p11), %vm672_vm15, %v1040_v24, 1 }
 0x2e4   : >> { %v659_v11 = vpop.xlane.xlu0 %658 }
 0x2e5   : >> { %vm660_vm13 = vcmp.eq.f32.partialorder %v657_v8, %v659_v11  ;;  %v665_v10 = vcvt.f32.s32 %v659_v11 }
 0x2e6   : >> { %v661_v14 = vsel %vm660_vm13, %v656_v12, inf }
 0x2e7   : >> { %662 = vmin.xlane.f32.xlu1 %v661_v14  ;;  %v666_v16 = vshll.u32 %v665_v10, 16 }
 0x374   : >> { %v663_v15 = vpop.xlane.xlu1 %662  ;;  %646 = sbr.rel (!%p644_p11) target bundleno = 451 (0x1c3), region = 119 }
 0x375   : >> { %v664_v17 = vcvt.f32.s32 %v663_v15 }
 0x377   : >> { %v667_v18 = vadd.s32 %v666_v16, %v664_v17 }
 0x379   : >> { %vm668_vm14 = vcmp.eq.s32.totalorder %v1439_v19, %v667_v18  ;;  %v1268_v19 = vmov (%p644_p11), %v700_v30  }
 0x37a   : >> { %v670_v2 = vsel %vm668_vm14, -1.0, %v1258_v2  }
 0x37b LB: >> { %v1285_v43 = vmov 0   ;;  %710 = vmin.xlane.f32.xlu0 %v1270_v19  ;;  %v713_v44 = vstv %s1274_s19  ;;  %s707_s19 = sadd.s32 1, %s1274_s19   ;;  %s1274_s19 = sphi %s1272_s19, %s707_s19   ;;  %v1270_v19 = vphi %v1268_v19, %v723_v19   ;;  %v1266_v42 = vphi %v1264_v42, %v1265_v42  }
 0x37c   : >> { %1163 = vset.pattern.permute.xlu0 %v1285_v43  ;;  %vm714_vm7 = vcmp.lt.s32.totalorder %v713_v44, %v673_v28  ;;  %p704_p12 = scmp.ge.s32.totalorder %s707_s19, 13  }
 0x37d   : >> { %vm715_vm8 = vmand %vm714_vm7, %vm404_vm3  ;;  %1034 = vmatprep.subr.mxu1 (%p704_p12), %v1277_v1  ;;  %1036 = vmatprep.mubr.msk.f32.mxu1 (%p704_p12), %vm1279_vm1, %v1277_v1  ;;  %v741_v50 = vld [vmem:[%s392_s13] sm:$0xf] (%p704_p12)  ;;  %s1582_s18 = scalar_lea.vmem (%p704_p12), %s1575_s6, %s1384_s17  ;;  %vm749_vm12 = vcmask (%p704_p12), 1043456   ;;  %vm751_vm3 = vcmask (%p704_p12), 1044480   ;;  %vm753_vm1 = vcmask (%p704_p12), 1045504   ;;  %vm755_vm14 = vcmask (%p704_p12), 64512  }
 0x37e   : >> { %v716_v45 = vsel %vm715_vm8, 1, %v1285_v43  ;;  %v1018_v52 = vld [vmem:[%s1582_s18] ss:$0 sm:$0xff] (%p704_p12)  ;;  %s1021_s17 = sshll.u32 (%p704_p12), %s1353_s9, 7  ;;  %s852_s12 = sshll.u32 (%p704_p12), %s372_s24, 4  ;;  %s1524_s12 = int_to_ptr.vmem [resolvable:$true] %s852_s12 }
 0x37f   : > { %v750_v54 = vsel (%p704_p12), %vm749_vm12, %v741_v50, %v1018_v52  ;;  %s1522_s26 = scalar_lea.hbm (%p704_p12), %s1577_s8, %s1021_s17  ;;  %s839_s9 = scalar_lea.sflag (%p704_p12), [#allocation5], %s370_s23 }
 0x380   : > { %v752_v1 = vsel (%p704_p12), %vm751_vm3, %v750_v54, 1.0  ;;  %s1164_s19 = scalar_lea.vmem (%p704_p12), %s1524_s12, 128  ;;  %s1286_s3 = smov (%p704_p12), [#allocation4]  }
 0x381   : > { %v754_v57 = vsel (%p704_p12), %vm753_vm1, %v752_v1, 0.0  ;;  %p1165_p13 = scmp.ne.s32.totalorder (%p704_p12), %s1524_s12, %s1164_s19  ;;  %s1168_s21 = sshll.u32 (%p704_p12), %s1286_s3, 4  ;;  %s1169_s21 = int_to_ptr.vmem [resolvable:$false] %s1168_s21 }
 0x382   : > { %s1170_s20 = scalar_lea.vmem (%p704_p12), %s1169_s21, 256  ;;  %p1171_p2 = scmp.lt.s32.totalorder (%p704_p12), %s1524_s12, %s1169_s21 }
 0x383   : > { %p1166_p0 = pnand (%p704_p12), %p1165_p13, %p1370_p5  ;;  %p1172_p3 = scmp.lt.s32.totalorder (%p704_p12), %s1170_s20, %s1164_s19 }
 0x385   : > { %p1167_p1 = pneg (%p704_p12), %p1166_p0  ;;  %p1173_p4 = por (%p704_p12), %p1172_p3, %p1171_p2 }
 0x387   : > { %p1174_p7 = pnand (%p704_p12), %p1173_p4, %p1167_p1 }
 0x391   : >> { %718 = vperm.xlu0 %1163, %v716_v45  }
 0x408   : >> { %v711_v5 = vpop.xlane.xlu0 %710 }
 0x409   : >> { %vm712_vm9 = vcmp.eq.f32.partialorder %v1270_v19, %v711_v5 }
 0x40a   : >> { %v723_v19 = vsel %vm712_vm9, 3e+38, %v1270_v19  }
 0x40e   : > { %706 = sbr.rel (!%p704_p12) target bundleno = 891 (0x37b), region = 130 }
 0x410   : >> { %v719_v46 = vpop.permute.xlu0 %718 }
 0x411   : >> { %vm720_vm10 = vcmp.eq.s32.totalorder %v719_v46, 1 }
 0x412   : >> { %vm721_vm11 = vmand %vm712_vm9, %vm720_vm10 }
 0x413   : >> { %v722_v47 = vsel %vm721_vm11, 1.0, %v1266_v42  }
 0x414   : >> { %v1265_v42 = vmov %v722_v47   ;;  %v724_v48 = vrot.slane (%p704_p12), %v722_v47, 4 }
 0x416   : > { %v725_v49 = vadd.f32 %v724_v48, %v722_v47 }
 0x418   : > { %v726_v21 = vrot.slane %v725_v49, 2 }
 0x41a   : > { %v727_v53 = vadd.f32 %v726_v21, %v725_v49 }
 0x41c   : > { %v728_v55 = vrot.slane %v727_v53, 1 }
 0x41e   : > { %v729_v56 = vadd.f32 %v728_v55, %v727_v53 }
 0x420   : > { %vm730_vm13 = vcmp.gt.f32.partialorder %v729_v56, 1.0 }
 0x421   : > { %v733_v58 = vsel %vm730_vm13, %v1017_v41, %v722_v47 }
 0x422   : > { %1035 = vmatpush3.msra.mxu1 %v733_v58  ;;  %v734_v59 = vmul.f32 %v733_v58, %v1474_v37 }
 0x423   : > { %1037 = vmatmul.mubr.msk.f32.vlgmr.msra.gmra.mrb[0].mxu1 %vm755_vm14, %v754_v57 }
 0x424   : > { %v735_v51 = vrot.slane %v734_v59, 4 }
 0x426   : > { %v736_v60 = vadd.f32 %v735_v51, %v734_v59 }
 0x428   : > { %v737_v61 = vrot.slane %v736_v60, 2 }
 0x42a   : > { %v738_v62 = vadd.f32 %v737_v61, %v736_v60 }
 0x42c   : > { %v739_v63 = vrot.slane %v738_v62, 1 }
 0x42e   : > { %v740_v0 = vadd.f32 %v739_v63, %v738_v62 }
 0x4f6   : > { %v825_v2 = vpop.f32.mrb[0].mxu1 }
 0x4f7   : > { %vm829_vm15 = vcmp.gt.f32.partialorder %v825_v2, 0.0  ;;  %v831_v3 = vrot.slane %v825_v2, 7  ;;  %v834_v4 = vsel %vm749_vm12, %v825_v2, %v740_v0  ;;  %v1038_v6 = vpop.f32.mrb[1].mxu1 }
 0x4f9   : > { %v833_v7 = vsel %vm829_vm15, %v831_v3, 4.0 }
 0x4fa   : > { %v835_v37 = vsel %vm751_vm3, %v834_v4, %v833_v7 }
 0x4fb   : > { %v836_v8 = vsel %vm753_vm1, %v835_v37, %v825_v2 }
 0x4fc   : > { %837 = vst [vmem:[%s372_s24] sm:$0xff] %v836_v8 }
 0x4fd   : > { %1177 = shalt.err (!%p1174_p7)
}
 0x4fe   : > { %s1178_s23 = scalar_lea.hbm %s1522_s26, 128  ;;  %s1182_s22 = scalar_lea.hbm %s1577_s8, 256 }
 0x4ff   : > { %p1179_p8 = scmp.ne.s32.totalorder %s1522_s26, %s1178_s23  ;;  %p1183_p11 = scmp.lt.u32.totalorder %s1522_s26, %s1577_s8 }
 0x500   : > { %p1184_p12 = scmp.lt.u32.totalorder %s1182_s22, %s1178_s23  ;;  %p1186_p0 = scmp.lt.u32.totalorder %s1178_s23, %s1522_s26 }
 0x501   : > { %p1180_p9 = pnand %p1179_p8, %p1370_p5 }
 0x502   : > { %p1185_p13 = por %p1184_p12, %p1183_p11 }
 0x503   : > { %p1181_p10 = pneg %p1180_p9 }
 0x504   : > { %p1187_p1 = por %p1186_p0, %p1185_p13 }
 0x506   : > { %p1188_p2 = pnand %p1187_p1, %p1181_p10 }
 0x508   : > { %1191 = shalt.err (!%p1188_p2)
}
 0x509   : > { %1041 = dma.vmem_to_hbm [thread:$0]  (%p1370_p5), %s1524_s12, 128, %s1522_s26, %s839_s9  }
 0x50a PF: > { %p1047_p3 = scmp.ge.s32.totalorder %s1250_s30, 2  ;;  %s864_s13 = sand.u32 1, %s1238_s27  }
 0x50b   : > { %s865_s25 = scalar_lea.sflag [#allocation5], %s864_s13 }
 0x50c   : > { %p1044_p4 = pnand %p1047_p3, %p1374_p6 }
 0x50e   : > { %1233 = dma.done.wait (!%p1044_p4), %s865_s25, 128  }
 0x50f   : > { %1235 = vsyncadd (!%p1044_p4), %s865_s25, 4294967168  ;;  %p18_p7 = scmp.ge.s32.totalorder %s1357_s11, 4   ;;  %s1583_s27 = smov %s1242_s28 }
 0x510   : > { %s1584_s28 = smov %s1246_s29  ;;  %s1585_s29 = smov %s1368_s14 }
 0x511   : > { %s1586_s30 = smov %s1357_s11  ;;  %20 = sbr.rel (!%p18_p7) target bundleno = 5 (0x5), region = 141 }
 0x518   :  { %870 = vsyncpa [#allocation5], 1 }
 0x519   :  { %872 = vsyncpa [#allocation5 + $0x1], 1 }

</bundles_post_ra>
